<compile_context>
chip_gen: v5e
topology: v5e:2x2
jax: 0.10.0
libtpu: 0.0.40
codegen_flags: <defaults>
</compile_context>

<pallas_src>
import math
import functools

import jax
import jax.numpy as jnp
from jax.experimental import pallas as pl
from jax.experimental.pallas import tpu as pltpu

LN_EPS = 1e-5
NEG_INF = -1e30   # large finite negative: avoids -inf arithmetic in the online softmax


def _layernorm(x, gamma, beta):
    # PyTorch LayerNorm: biased variance, eps inside rsqrt.
    mu = jnp.mean(x, axis=-1, keepdims=True)
    var = jnp.mean((x - mu) ** 2, axis=-1, keepdims=True)
    return (x - mu) * jax.lax.rsqrt(var + LN_EPS) * gamma + beta


def _gelu_tanh(x):
    # GELU(approximate='tanh')
    c = math.sqrt(2.0 / math.pi)
    return 0.5 * x * (1.0 + jnp.tanh(c * (x + 0.044715 * x * x * x)))


# --------------------------- kernel A: LN1 + QKV projection ---------------------------
def qkv_kernel(x_ref, g1_ref, b1_ref, w_qkv_ref, b_qkv_ref,
               q_ref, k_ref, v_ref, *, n_head):
    x = x_ref[0]                                      # (tq, C) f32
    C = x.shape[-1]
    D = C // n_head
    scale = jnp.float32(1.0 / math.sqrt(D))

    h = _layernorm(x, g1_ref[0], b1_ref[0]).astype(jnp.bfloat16)
    qkv = jnp.dot(h, w_qkv_ref[...],
                  preferred_element_type=jnp.float32) + b_qkv_ref[0]   # (tq, 3C) f32

    q_ref[0] = (qkv[:, 0 * C:1 * C] * scale).astype(jnp.bfloat16)      # 1/sqrt(D) folded in
    k_ref[0] = qkv[:, 1 * C:2 * C].astype(jnp.bfloat16)
    v_ref[0] = qkv[:, 2 * C:3 * C].astype(jnp.bfloat16)


# -------- kernel B: flash-style causal attention + out-proj + first residual ----------
def attn_kernel(x_ref, q_ref, k_ref, v_ref, wp_ref, bp_ref,
                x1_ref, m_sc, l_sc, acc_sc):
    i = pl.program_id(1)              # q-tile index
    j = pl.program_id(2)              # k-tile index (reduction axis, tk == tq)
    _, H, tq, D = q_ref.shape
    tk = k_ref.shape[2]
    C = x_ref.shape[-1]

    @pl.when(j == 0)
    def _():
        m_sc[...] = jnp.full(m_sc.shape, NEG_INF, jnp.float32)
        l_sc[...] = jnp.zeros(l_sc.shape, jnp.float32)
        acc_sc[...] = jnp.zeros(acc_sc.shape, jnp.float32)

    def online_step(diagonal):
        q = q_ref[0]                                   # (H, tq, D) bf16, pre-scaled
        k = k_ref[0]                                   # (H, tk, D) bf16
        v = v_ref[0]                                   # (H, tk, D) bf16
        s = jnp.einsum('hqd,hkd->hqk', q, k,
                       preferred_element_type=jnp.float32)             # (H, tq, tk) f32
        if diagonal:                                   # mask only on the diagonal tile
            row = jax.lax.broadcasted_iota(jnp.int32, (tq, tk), 0)
            col = jax.lax.broadcasted_iota(jnp.int32, (tq, tk), 1)
            s = jnp.where((row >= col)[None], s, NEG_INF)
        m_prev = m_sc[...]
        m_new = jnp.maximum(m_prev, jnp.max(s, axis=-1, keepdims=True))
        alpha = jnp.exp(m_prev - m_new)
        p = jnp.exp(s - m_new)
        l_sc[...] = alpha * l_sc[...] + jnp.sum(p, axis=-1, keepdims=True)
        pv = jnp.einsum('hqk,hkd->hqd', p.astype(jnp.bfloat16), v,
                        preferred_element_type=jnp.float32)            # (H, tq, D) f32
        acc_sc[...] = alpha * acc_sc[...] + pv
        m_sc[...] = m_new

    @pl.when(j < i)                   # fully-visible tile: no masking work at all
    def _():
        online_step(False)

    @pl.when(j == i)                  # diagonal tile: mask, then finalize this q-tile
    def _():
        online_step(True)
        # normalize the (H, tq, D) accumulator, not the (tq, tk) score matrix
        acc = (acc_sc[...] * pl.reciprocal(l_sc[...], approx=True)).astype(jnp.bfloat16)
        # per-head output projection accumulated straight into a lane-dense (tq, C) slab
        y = jnp.zeros((tq, C), jnp.float32)
        for h in range(H):
            y = y + jnp.dot(acc[h], wp_ref[h], preferred_element_type=jnp.float32)
        x1_ref[0] = x_ref[0] + y + bp_ref[0]           # first residual
    # j > i: the whole tile is above the causal diagonal -> nothing to do (the k/v
    # index_map clamps the block index to the diagonal tile, so the DMA is skipped too).


# ------------------ kernel C: LN2 + MLP (hidden dim tiled) + residual ------------------
def mlp_kernel(x1_ref, g2_ref, b2_ref, w_fc_ref, b_fc_ref, w_mp_ref, b_mp_ref,
               o_ref, h2_sc, acc_sc, *, gelu_dtype):
    jh = pl.program_id(2)             # hidden-dim tile index (reduction axis)

    @pl.when(jh == 0)
    def _():
        # LN2 computed once per (batch, q-tile) and cached in VMEM for all hidden tiles
        h2_sc[...] = _layernorm(x1_ref[0], g2_ref[0], b2_ref[0]).astype(jnp.bfloat16)
        acc_sc[...] = jnp.zeros(acc_sc.shape, jnp.float32)

    m = jnp.dot(h2_sc[...], w_fc_ref[...],
                preferred_element_type=jnp.float32) + b_fc_ref[0]      # (tq, th) f32
    m = _gelu_tanh(m.astype(gelu_dtype))       # bf16 on v6e/v7x, f32 on v5e and older
    acc_sc[...] += jnp.dot(m.astype(jnp.bfloat16), w_mp_ref[...],
                           preferred_element_type=jnp.float32)         # (tq, C) f32

    @pl.when(jh == pl.num_programs(2) - 1)
    def _():
        o_ref[0] = x1_ref[0] + acc_sc[...] + b_mp_ref[0]               # second residual


# ------------------------------------ wrapper ------------------------------------------
def _vmem_limit_bytes():
    # generation-aware VMEM budget with headroom for compiler-internal scratch
    try:
        cap = pltpu.get_tpu_info().vmem_capacity_bytes
        return int(min(cap * 7 // 8, 112 * 1024 * 1024))  # ~56 MiB on v7x, 112 MiB on v5e/v6e
    except Exception:
        return 48 * 1024 * 1024


def _device_is_old_gen():
    try:
        kind = jax.devices()[0].device_kind.lower()
    except Exception:
        return True
    return any(v in kind for v in ("v2", "v3", "v4", "v5"))


def gpt_block(x, params, n_head):
    """x: (B, T, C) float32. params: dict of (in, out)-transposed weights and (1, out) biases."""
    B, T, C = x.shape
    assert C % n_head == 0
    H, D = n_head, C // n_head
    hidden = 4 * C

    old_gen = _device_is_old_gen()
    # q/k tile size: 256 on v6e/v7x (2x256x256 MXU), 128 on v5e and older
    if not old_gen and T >= 256 and T % 256 == 0:
        tq = 256
    elif T >= 128 and T % 128 == 0:
        tq = 128
    else:
        tq = T    # TODO(synk): pad T to a tile multiple to pipeline ragged sequence lengths
    th = 512 if (hidden % 512 == 0 and hidden > 512) else hidden       # MLP hidden tile
    gelu_dtype = jnp.float32 if old_gen else jnp.bfloat16
    vmem_limit = _vmem_limit_bytes()

    n_qt, n_kt, n_ht = T // tq, T // tq, hidden // th

    # matmul weights pre-cast to bf16 once (MXU inputs; halves weight DMA / VMEM)
    w_qkv = params["w_qkv"].astype(jnp.bfloat16)
    w_attp = params["w_attp"].reshape(H, D, C).astype(jnp.bfloat16)    # per-head row blocks
    w_fc = params["w_fc"].astype(jnp.bfloat16)
    w_mp = params["w_mp"].astype(jnp.bfloat16)

    cparams2 = pltpu.CompilerParams(
        dimension_semantics=("parallel", "parallel"), vmem_limit_bytes=vmem_limit)
    cparams3 = pltpu.CompilerParams(
        dimension_semantics=("parallel", "parallel", "arbitrary"),
        vmem_limit_bytes=vmem_limit)

    tile2 = pl.BlockSpec((1, tq, C), lambda b, i: (b, i, 0))
    tile3 = pl.BlockSpec((1, tq, C), lambda b, i, j: (b, i, 0))
    vec2 = lambda n: pl.BlockSpec((1, n), lambda b, i: (0, 0))
    vec3 = lambda n: pl.BlockSpec((1, n), lambda b, i, j: (0, 0))

    # ------------------------------- kernel A call -------------------------------
    qkv_call = pl.pallas_call(
        functools.partial(qkv_kernel, n_head=H),
        out_shape=tuple(jax.ShapeDtypeStruct((B, T, C), jnp.bfloat16) for _ in range(3)),
        grid_spec=pltpu.PrefetchScalarGridSpec(
            num_scalar_prefetch=0,
            grid=(B, n_qt),
            in_specs=[tile2, vec2(C), vec2(C),
                      pl.BlockSpec((C, 3 * C), lambda b, i: (0, 0)), vec2(3 * C)],
            out_specs=[tile2, tile2, tile2]),
        compiler_params=cparams2,
        cost_estimate=pl.CostEstimate(
            flops=2 * B * T * C * 3 * C,
            transcendentals=B * T,
            bytes_accessed=B * T * C * 4 + 3 * C * C * 2 + 3 * B * T * C * 2),
    )

    # ------------------------------- kernel B call -------------------------------
    q_spec = pl.BlockSpec((1, H, tq, D), lambda b, i, j: (b, 0, i, 0))
    # clamp to the diagonal tile so k/v DMAs are skipped for fully-masked tiles
    kv_spec = pl.BlockSpec((1, H, tq, D),
                           lambda b, i, j: (b, 0, jnp.minimum(j, i), 0))
    attn_call = pl.pallas_call(
        attn_kernel,
        out_shape=jax.ShapeDtypeStruct((B, T, C), jnp.float32),
        grid_spec=pltpu.PrefetchScalarGridSpec(
            num_scalar_prefetch=0,
            grid=(B, n_qt, n_kt),
            in_specs=[tile3, q_spec, kv_spec, kv_spec,
                      pl.BlockSpec((H, D, C), lambda b, i, j: (0, 0, 0)), vec3(C)],
            out_specs=tile3,
            scratch_shapes=[pltpu.VMEM((H, tq, 1), jnp.float32),     # running max
                            pltpu.VMEM((H, tq, 1), jnp.float32),     # running sum
                            pltpu.VMEM((H, tq, D), jnp.float32)]),   # running PV accumulator
        compiler_params=cparams3,
        cost_estimate=pl.CostEstimate(
            flops=2 * B * H * T * T * D + 2 * B * T * C * C,    # causal ~halves the QK/PV term
            transcendentals=B * H * T * T // 2,
            bytes_accessed=2 * B * T * C * 4 + 3 * B * T * C * 2 + C * C * 2),
    )

    # ------------------------------- kernel C call -------------------------------
    mlp_call = pl.pallas_call(
        functools.partial(mlp_kernel, gelu_dtype=gelu_dtype),
        out_shape=jax.ShapeDtypeStruct((B, T, C), jnp.float32),
        grid_spec=pltpu.PrefetchScalarGridSpec(
            num_scalar_prefetch=0,
            grid=(B, n_qt, n_ht),
            in_specs=[tile3, vec3(C), vec3(C),
                      pl.BlockSpec((C, th), lambda b, i, j: (0, j)),
                      pl.BlockSpec((1, th), lambda b, i, j: (0, j)),
                      pl.BlockSpec((th, C), lambda b, i, j: (j, 0)),
                      vec3(C)],
            out_specs=tile3,
            scratch_shapes=[pltpu.VMEM((tq, C), jnp.bfloat16),       # cached LN2(x1)
                            pltpu.VMEM((tq, C), jnp.float32)]),      # MLP accumulator
        compiler_params=cparams3,
        cost_estimate=pl.CostEstimate(
            flops=4 * B * T * C * hidden,
            transcendentals=B * T * hidden,
            bytes_accessed=2 * B * T * C * 4 + 2 * C * hidden * 2),
    )

    # ----------------------------------- run -----------------------------------
    q, k, v = qkv_call(x, params["ln1_g"], params["ln1_b"], w_qkv, params["b_qkv"])
    # (B, T, C) -> (B, H, T, D): cheap XLA transpose between the calls
    # (could be folded into kernel A's output layout if it ever shows up in profiles)
    split = lambda a: a.reshape(B, T, H, D).transpose(0, 2, 1, 3)
    x1 = attn_call(x, split(q), split(k), split(v), w_attp, params["b_attp"])
    return mlp_call(x1, params["ln2_g"], params["ln2_b"],
                    w_fc, params["b_fc"], w_mp, params["b_mp"])


# -------------------- pure-JAX reference (for verification) --------------------
def ref_block(x, p, n_head):
    B, T, C = x.shape
    D = C // n_head

    def ln(v, g, b):
        mu = v.mean(-1, keepdims=True)
        var = ((v - mu) ** 2).mean(-1, keepdims=True)
        return (v - mu) / jnp.sqrt(var + LN_EPS) * g[0] + b[0]

    h = ln(x, p["ln1_g"], p["ln1_b"])
    qkv = h @ p["w_qkv"] + p["b_qkv"][0]
    q, k, v = jnp.split(qkv, 3, axis=-1)
    q = q.reshape(B, T, n_head, D).transpose(0, 2, 1, 3)
    k = k.reshape(B, T, n_head, D).transpose(0, 2, 1, 3)
    v = v.reshape(B, T, n_head, D).transpose(0, 2, 1, 3)
    att = jnp.einsum("bhtd,bhsd->bhts", q, k) / math.sqrt(D)
    mask = jnp.tril(jnp.ones((T, T), bool))
    att = jnp.where(mask, att, -jnp.inf)
    att = jax.nn.softmax(att, axis=-1)
    y = jnp.einsum("bhts,bhsd->bhtd", att, v).transpose(0, 2, 1, 3).reshape(B, T, C)
    y = y @ p["w_attp"] + p["b_attp"][0]
    x1 = x + y
    h2 = ln(x1, p["ln2_g"], p["ln2_b"])
    m = h2 @ p["w_fc"] + p["b_fc"][0]
    m = _gelu_tanh(m)
    m = m @ p["w_mp"] + p["b_mp"][0]
    return x1 + m


def _make_params(key, C):
    ks = jax.random.split(key, 8)

    def lin(kw, kb, fi, fo):
        return (0.02 * jax.random.normal(kw, (fi, fo), jnp.float32),
                0.02 * jax.random.normal(kb, (1, fo), jnp.float32))

    w_qkv, b_qkv = lin(ks[0], ks[1], C, 3 * C)
    w_attp, b_attp = lin(ks[2], ks[3], C, C)
    w_fc, b_fc = lin(ks[4], ks[5], C, 4 * C)
    w_mp, b_mp = lin(ks[6], ks[7], 4 * C, C)
    return dict(
        ln1_g=jnp.ones((1, C), jnp.float32), ln1_b=jnp.zeros((1, C), jnp.float32),
        w_qkv=w_qkv, b_qkv=b_qkv, w_attp=w_attp, b_attp=b_attp,
        ln2_g=jnp.ones((1, C), jnp.float32), ln2_b=jnp.zeros((1, C), jnp.float32),
        w_fc=w_fc, b_fc=b_fc, w_mp=w_mp, b_mp=b_mp)


if __name__ == "__main__":
    key = jax.random.PRNGKey(0)
    k_small, k_big, kx1, kx2 = jax.random.split(key, 4)

    # small config from the module spec: n_embd=32, n_head=4, seq T=8
    B, T, C, H = 2, 8, 32, 4
    params = _make_params(k_small, C)
    x = jax.random.normal(kx1, (B, T, C), jnp.float32)
    out = jax.block_until_ready(gpt_block(x, params, H))
    ref = ref_block(x, params, H)
    assert out.shape == (B, T, C)
    # bf16 matmul inputs + approx reciprocal in softmax -> loosened tolerance vs f32 ref
    assert jnp.allclose(out, ref, atol=2e-2, rtol=2e-2), "small-config mismatch vs reference"

    # larger config to exercise the tiled paths (multiple k-tiles, causal skip, hidden tiles)
    B2, T2, C2, H2 = 1, 512, 256, 4
    params2 = _make_params(k_big, C2)
    x2 = jax.random.normal(kx2, (B2, T2, C2), jnp.float32)
    out2 = jax.block_until_ready(gpt_block(x2, params2, H2))
    ref2 = ref_block(x2, params2, H2)
    assert jnp.allclose(out2, ref2, atol=2e-2, rtol=2e-2), "tiled-config mismatch vs reference"

    print("KERNEL_OK")
</pallas_src>

<mosaic_0001>
module attributes {stable_mosaic.version = 11 : i64} {
  func.func @qkv_kernel(%arg0: i32, %arg1: i32, %arg2: memref<1x8x32xf32, #tpu.memory_space<vmem>>, %arg3: memref<1x32xf32, #tpu.memory_space<vmem>>, %arg4: memref<1x32xf32, #tpu.memory_space<vmem>>, %arg5: memref<32x96xbf16, #tpu.memory_space<vmem>>, %arg6: memref<1x96xf32, #tpu.memory_space<vmem>>, %arg7: memref<1x8x32xbf16, #tpu.memory_space<vmem>>, %arg8: memref<1x8x32xbf16, #tpu.memory_space<vmem>>, %arg9: memref<1x8x32xbf16, #tpu.memory_space<vmem>>) attributes {dimension_semantics = [#tpu.dimension_semantics<parallel>, #tpu.dimension_semantics<parallel>], iteration_bounds = array<i64: 2, 1>, scalar_prefetch = 0 : i64, scratch_operands = 0 : i64, tpu.core_type = #tpu.core_type<tc>, window_params = [{transform_indices = @transform_0, window_bounds = array<i64: 1, 8, 32>}, {pipeline_mode = #tpu.pipeline_mode<synchronous>, transform_indices = @transform_1, window_bounds = array<i64: 1, 32>}, {pipeline_mode = #tpu.pipeline_mode<synchronous>, transform_indices = @transform_2, window_bounds = array<i64: 1, 32>}, {pipeline_mode = #tpu.pipeline_mode<synchronous>, transform_indices = @transform_3, window_bounds = array<i64: 32, 96>}, {pipeline_mode = #tpu.pipeline_mode<synchronous>, transform_indices = @transform_4, window_bounds = array<i64: 1, 96>}, {transform_indices = @transform_5, window_bounds = array<i64: 1, 8, 32>}, {transform_indices = @transform_6, window_bounds = array<i64: 1, 8, 32>}, {transform_indices = @transform_7, window_bounds = array<i64: 1, 8, 32>}]} {
    %c0 = arith.constant 0 : index
    %c0_0 = arith.constant 0 : index
    %c0_1 = arith.constant 0 : index
    %0 = vector.load %arg2[%c0, %c0_0, %c0_1] : memref<1x8x32xf32, #tpu.memory_space<vmem>>, vector<1x8x32xf32>
    %1 = vector.shape_cast %0 : vector<1x8x32xf32> to vector<8x32xf32>
    %c0_2 = arith.constant 0 : index
    %c0_3 = arith.constant 0 : index
    %2 = vector.load %arg3[%c0_2, %c0_3] : memref<1x32xf32, #tpu.memory_space<vmem>>, vector<1x32xf32>
    %3 = vector.shape_cast %2 : vector<1x32xf32> to vector<32xf32>
    %c0_4 = arith.constant 0 : index
    %c0_5 = arith.constant 0 : index
    %4 = vector.load %arg4[%c0_4, %c0_5] : memref<1x32xf32, #tpu.memory_space<vmem>>, vector<1x32xf32>
    %5 = vector.shape_cast %4 : vector<1x32xf32> to vector<32xf32>
    %cst = arith.constant dense<0.000000e+00> : vector<8xf32>
    %6 = vector.multi_reduction <add>, %1, %cst [1] : vector<8x32xf32> to vector<8xf32>
    %7 = vector.shape_cast %6 : vector<8xf32> to vector<8x1xf32>
    %cst_6 = arith.constant 3.200000e+01 : f32
    %8 = vector.broadcast %cst_6 : f32 to vector<8x1xf32>
    %9 = arith.divf %7, %8 : vector<8x1xf32>
    %10 = vector.broadcast %9 : vector<8x1xf32> to vector<8x32xf32>
    %11 = arith.subf %1, %10 : vector<8x32xf32>
    %12 = arith.mulf %11, %11 : vector<8x32xf32>
    %cst_7 = arith.constant dense<0.000000e+00> : vector<8xf32>
    %13 = vector.multi_reduction <add>, %12, %cst_7 [1] : vector<8x32xf32> to vector<8xf32>
    %14 = vector.shape_cast %13 : vector<8xf32> to vector<8x1xf32>
    %cst_8 = arith.constant 3.200000e+01 : f32
    %15 = vector.broadcast %cst_8 : f32 to vector<8x1xf32>
    %16 = arith.divf %14, %15 : vector<8x1xf32>
    %17 = vector.broadcast %9 : vector<8x1xf32> to vector<8x32xf32>
    %18 = arith.subf %1, %17 : vector<8x32xf32>
    %cst_9 = arith.constant 9.99999974E-6 : f32
    %19 = vector.broadcast %cst_9 : f32 to vector<8x1xf32>
    %20 = arith.addf %16, %19 : vector<8x1xf32>
    %21 = math.rsqrt %20 : vector<8x1xf32>
    %22 = vector.broadcast %21 : vector<8x1xf32> to vector<8x32xf32>
    %23 = arith.mulf %18, %22 : vector<8x32xf32>
    %24 = vector.shape_cast %3 : vector<32xf32> to vector<1x32xf32>
    %25 = vector.broadcast %24 : vector<1x32xf32> to vector<8x32xf32>
    %26 = arith.mulf %23, %25 : vector<8x32xf32>
    %27 = vector.shape_cast %5 : vector<32xf32> to vector<1x32xf32>
    %28 = vector.broadcast %27 : vector<1x32xf32> to vector<8x32xf32>
    %29 = arith.addf %26, %28 : vector<8x32xf32>
    %30 = arith.truncf %29 : vector<8x32xf32> to vector<8x32xbf16>
    %c0_10 = arith.constant 0 : index
    %c0_11 = arith.constant 0 : index
    %31 = vector.load %arg5[%c0_10, %c0_11] : memref<32x96xbf16, #tpu.memory_space<vmem>>, vector<32x96xbf16>
    %cst_12 = arith.constant dense<0.000000e+00> : vector<8x96xf32>
    %32 = tpu.matmul %30, %31, %cst_12 {dimension_numbers = #tpu.dot_dimension_numbers<[1], [0], [0], [1], [0, 0, 1, 1], [], []>} : vector<8x32xbf16>, vector<32x96xbf16>, vector<8x96xf32> -> vector<8x96xf32>
    %c0_13 = arith.constant 0 : index
    %c0_14 = arith.constant 0 : index
    %33 = vector.load %arg6[%c0_13, %c0_14] : memref<1x96xf32, #tpu.memory_space<vmem>>, vector<1x96xf32>
    %34 = vector.shape_cast %33 : vector<1x96xf32> to vector<96xf32>
    %35 = vector.shape_cast %34 : vector<96xf32> to vector<1x96xf32>
    %36 = vector.broadcast %35 : vector<1x96xf32> to vector<8x96xf32>
    %37 = arith.addf %32, %36 : vector<8x96xf32>
    %38 = vector.extract_strided_slice %37 {offsets = [0, 0], sizes = [8, 32], strides = [1, 1]} : vector<8x96xf32> to vector<8x32xf32>
    %cst_15 = arith.constant 0.353553385 : f32
    %39 = vector.broadcast %cst_15 : f32 to vector<8x32xf32>
    %40 = arith.mulf %38, %39 : vector<8x32xf32>
    %41 = arith.truncf %40 : vector<8x32xf32> to vector<8x32xbf16>
    %c0_16 = arith.constant 0 : index
    %c0_17 = arith.constant 0 : index
    %c0_18 = arith.constant 0 : index
    %42 = vector.load %arg7[%c0_16, %c0_17, %c0_18] : memref<1x8x32xbf16, #tpu.memory_space<vmem>>, vector<1x8x32xbf16>
    %43 = vector.shape_cast %42 : vector<1x8x32xbf16> to vector<8x32xbf16>
    %44 = vector.shape_cast %41 : vector<8x32xbf16> to vector<1x8x32xbf16>
    tpu.vector_store %arg7[%c0_16, %c0_17, %c0_18], %44 {strides = array<i32>} : memref<1x8x32xbf16, #tpu.memory_space<vmem>>, vector<1x8x32xbf16>,
    %45 = vector.extract_strided_slice %37 {offsets = [0, 32], sizes = [8, 32], strides = [1, 1]} : vector<8x96xf32> to vector<8x32xf32>
    %46 = arith.truncf %45 : vector<8x32xf32> to vector<8x32xbf16>
    %c0_19 = arith.constant 0 : index
    %c0_20 = arith.constant 0 : index
    %c0_21 = arith.constant 0 : index
    %47 = vector.load %arg8[%c0_19, %c0_20, %c0_21] : memref<1x8x32xbf16, #tpu.memory_space<vmem>>, vector<1x8x32xbf16>
    %48 = vector.shape_cast %47 : vector<1x8x32xbf16> to vector<8x32xbf16>
    %49 = vector.shape_cast %46 : vector<8x32xbf16> to vector<1x8x32xbf16>
    tpu.vector_store %arg8[%c0_19, %c0_20, %c0_21], %49 {strides = array<i32>} : memref<1x8x32xbf16, #tpu.memory_space<vmem>>, vector<1x8x32xbf16>,
    %50 = vector.extract_strided_slice %37 {offsets = [0, 64], sizes = [8, 32], strides = [1, 1]} : vector<8x96xf32> to vector<8x32xf32>
    %51 = arith.truncf %50 : vector<8x32xf32> to vector<8x32xbf16>
    %c0_22 = arith.constant 0 : index
    %c0_23 = arith.constant 0 : index
    %c0_24 = arith.constant 0 : index
    %52 = vector.load %arg9[%c0_22, %c0_23, %c0_24] : memref<1x8x32xbf16, #tpu.memory_space<vmem>>, vector<1x8x32xbf16>
    %53 = vector.shape_cast %52 : vector<1x8x32xbf16> to vector<8x32xbf16>
    %54 = vector.shape_cast %51 : vector<8x32xbf16> to vector<1x8x32xbf16>
    tpu.vector_store %arg9[%c0_22, %c0_23, %c0_24], %54 {strides = array<i32>} : memref<1x8x32xbf16, #tpu.memory_space<vmem>>, vector<1x8x32xbf16>,
    return
  }
  func.func @transform_0(%arg0: i32, %arg1: i32) -> (i32, i32, i32) {
    %c0_i32 = arith.constant 0 : i32
    %c0_i32_0 = arith.constant 0 : i32
    return %arg0, %arg1, %c0_i32 : i32, i32, i32
  }
  func.func @transform_1(%arg0: i32, %arg1: i32) -> (i32, i32) {
    %c0_i32 = arith.constant 0 : i32
    %c0_i32_0 = arith.constant 0 : i32
    %c0_i32_1 = arith.constant 0 : i32
    return %c0_i32, %c0_i32_0 : i32, i32
  }
  func.func @transform_2(%arg0: i32, %arg1: i32) -> (i32, i32) {
    %c0_i32 = arith.constant 0 : i32
    %c0_i32_0 = arith.constant 0 : i32
    %c0_i32_1 = arith.constant 0 : i32
    return %c0_i32, %c0_i32_0 : i32, i32
  }
  func.func @transform_3(%arg0: i32, %arg1: i32) -> (i32, i32) {
    %c0_i32 = arith.constant 0 : i32
    %c0_i32_0 = arith.constant 0 : i32
    %c0_i32_1 = arith.constant 0 : i32
    return %c0_i32, %c0_i32_0 : i32, i32
  }
  func.func @transform_4(%arg0: i32, %arg1: i32) -> (i32, i32) {
    %c0_i32 = arith.constant 0 : i32
    %c0_i32_0 = arith.constant 0 : i32
    %c0_i32_1 = arith.constant 0 : i32
    return %c0_i32, %c0_i32_0 : i32, i32
  }
  func.func @transform_5(%arg0: i32, %arg1: i32) -> (i32, i32, i32) {
    %c0_i32 = arith.constant 0 : i32
    %c0_i32_0 = arith.constant 0 : i32
    return %arg0, %arg1, %c0_i32 : i32, i32, i32
  }
  func.func @transform_6(%arg0: i32, %arg1: i32) -> (i32, i32, i32) {
    %c0_i32 = arith.constant 0 : i32
    %c0_i32_0 = arith.constant 0 : i32
    return %arg0, %arg1, %c0_i32 : i32, i32, i32
  }
  func.func @transform_7(%arg0: i32, %arg1: i32) -> (i32, i32, i32) {
    %c0_i32 = arith.constant 0 : i32
    %c0_i32_0 = arith.constant 0 : i32
    return %arg0, %arg1, %c0_i32 : i32, i32, i32
  }
}

</mosaic_0001>

<bundles_post_ra>
// kernel: tpu_custom_call.1
= control target key start
LH: loop header
LB: loop body
LE: loop exit
PB: predicated region body
PF: predicated region fallthrough
CT: control target
= control target key end

     0   :  { %s1304_s0 = inlined_call_operand.hbm [shape: f32[2,8,32], index: 0, kind: input, shape index: {}]   ;;  %s1305_s1 = inlined_call_operand.hbm [shape: f32[1,32], index: 1, kind: input, shape index: {}]   ;;  %s1306_s2 = inlined_call_operand.vmem [shape: f32[1,32], index: 2, kind: input, shape index: {}]   ;;  %s1307_s3 = inlined_call_operand.hbm [shape: bf16[32,96], index: 3, kind: input, shape index: {}]   ;;  %s1308_s4 = inlined_call_operand.vmem [shape: f32[1,96], index: 4, kind: input, shape index: {}]   ;;  %s1309_s5 = inlined_call_operand.hbm [shape: bf16[2,8,32], index: 5, kind: output, shape index: {0}]   ;;  %s1310_s6 = inlined_call_operand.hbm [shape: bf16[2,8,32], index: 6, kind: output, shape index: {1}]   ;;  %s1311_s7 = inlined_call_operand.hbm [shape: bf16[2,8,32], index: 7, kind: output, shape index: {2}]  }
   0x1   :  { %1313 = sst [smem:[#allocation16_spill]] %s1304_s0 }
   0x2   :  { %1314 = sst [smem:[#allocation17_spill]] %s1305_s1 }
   0x3   :  { %1315 = sst [smem:[#allocation18_spill]] %s1307_s3 }
   0x4   :  { %13 = vsyncpa [#allocation3], 0 }
   0x5   :  { %15 = vsyncpa [#allocation3 + $0x1], 0 }
   0x6   :  { %16 = vsyncpa [#allocation6], 0 }
   0x7   :  { %17 = vsyncpa [#allocation4], 0 }
   0x8   :  { %19 = vsyncpa [#allocation4 + $0x1], 0 }
   0x9   :  { %20 = vsyncpa [#allocation10], 0 }
   0xa   :  { %22 = vsyncpa [#allocation10 + $0x1], 0  ;;  %s1104_s24 = smov 0   ;;  %s1106_s25 = smov 0  }
   0xb   :  { %s1108_s26 = smov 0   ;;  %s1110_s27 = smov 0  }
   0xc   :  { %s1112_s28 = smov 0   ;;  %s1114_s29 = smov 0  }
   0xd LB: > { %s1135_s30 = sadd.s32 4294967295, %s1055_s29   ;;  %s1312_s8 = sadd.s32 4294967294, %s1055_s29   ;;  %s1055_s29 = sphi %s1114_s29, %s28_s29   ;;  %s1051_s28 = sphi %s1112_s28, %s1328_s28   ;;  %s1047_s27 = sphi %s1110_s27, %s1327_s27   ;;  %s1043_s26 = sphi %s1108_s26, %s1326_s26   ;;  %s1039_s25 = sphi %s1106_s25, %s1325_s25   ;;  %s1035_s24 = sphi %s1104_s24, %s1324_s24  }
   0xe   : > { %p62_p0 = scmp.ne.s32.totalorder %s1039_s25, %s1035_s24  ;;  %p63_p1 = scmp.eq.s32.totalorder %s1135_s30, 0 }
   0xf   : > { %p178_p2 = scmp.eq.s32.totalorder %s1312_s8, 1  ;;  %p682_p4 = scmp.ge.s32.totalorder %s1055_s29, 1 }
  0x10   : > { %p1145_p3 = por %p63_p1, %p62_p0  ;;  %p241_p6 = scmp.lt.s32.totalorder %s1055_s29, 3 }
  0x11   : > { %p1150_p5 = por %p178_p2, %p62_p0  ;;  %s1318_s1 = sld [smem:[#allocation17_spill]] }
  0x12   : > { %p1158_p7 = pnand %p682_p4, %p241_p6  ;;  %p685_p8 = scmp.ge.s32.totalorder %s1055_s29, 2 }
  0x13   : > { %s1057_s15 = smov [#allocation5]   ;;  %s1320_s3 = sld [smem:[#allocation18_spill]] }
  0x14   : > { %p730_p9 = pneg %p1158_p7  ;;  %s255_s16 = sshll.u32 %s1057_s15, 4  ;;  %s256_s16 = int_to_ptr.vmem [resolvable:$true] %s255_s16 }
  0x15   : > { %s1058_s20 = smov [#allocation7]   ;;  %s1059_s22 = smov 64  }
  0x16   : > { %p731_p10 = pnand %p730_p9, %p63_p1  ;;  %s269_s21 = sshll.u32 %s1058_s20, 4  ;;  %s270_s21 = int_to_ptr.vmem [resolvable:$true] %s269_s21 }
  0x17   : > { %s253_s13 = sshll.u32 %s1318_s1, 4  ;;  %s1060_s23 = smov 4   ;;  %s254_s13 = int_to_ptr.hbm [resolvable:$true] %s253_s13 }
  0x18   : > { %733 = dma.hbm_to_vmem [thread:$0]  (!%p731_p10), %s254_s13, 16, %s256_s16, [#allocation6]  }
  0x19   : > { %s267_s19 = sshll.u32 %s1320_s3, 4  ;;  %p172_p11 = scmp.eq.s32.totalorder %s1135_s30, 1  ;;  %s268_s19 = int_to_ptr.hbm [resolvable:$true] %s267_s19 }
  0x1a   : > { %736 = dma.hbm_to_vmem [thread:$0]  (!%p731_p10), %s268_s19, 256, %s270_s21, [#allocation6], %s1059_s22, %s1059_s22, %s1060_s23  }
  0x1b   : > { %s40_s11 = sadd.s32 1, %s1051_s28  ;;  %s49_s12 = sadd.s32 1, %s1043_s26 }
  0x1c   : > { %p42_p12 = scmp.ge.s32.totalorder %s40_s11, 2  ;;  %p56_p13 = scmp.ne.s32.totalorder %s1043_s26, %s1039_s25 }
  0x1d   : > { %p57_p0 = scmp.eq.s32.totalorder %s1055_s29, 0  ;;  %p753_p4 = scmp.lt.s32.totalorder %s1055_s29, 2 }
  0x1e   : > { %s1330_s11 = smov (%p42_p12, %s40_s11), 0  ;;  %p1178_p2 = por %p172_p11, %p56_p13 }
  0x1f   : > { %s44_s13 = ssub.s32 %s1051_s28, %s1330_s11  ;;  %s286_s16 = sand.u32 1, %s1043_s26  }
  0x20   : > { %p47_p6 = scmp.eq.s32.totalorder %s44_s13, 0  ;;  %p58_p9 = por %p57_p0, %p56_p13 }
  0x21   : > { %s686_s17 = sshll.u32 %s286_s16, 3  ;;  %s687_s18 = sshll.u32 %s1051_s28, 3 }
  0x22   : > { %s1188_s19 = scalar_select %p47_p6, %s1043_s26, %s49_s12  }
  0x23   : > { %s1322_s0 = sld [smem:[#allocation16_spill]]  ;;  %s290_s8 = scalar_lea.vmem [#allocation2], %s686_s17 }
  0x24   : > { %s299_s1 = sshll.u32 %s290_s8, 4  ;;  %p738_p10 = pnand %p753_p4, %p58_p9  ;;  %s300_s1 = int_to_ptr.vmem [resolvable:$true] %s299_s1 }
  0x25   : > { %s287_s3 = scalar_lea.sflag [#allocation3], %s286_s16  ;;  %s1198_s12 = sand.u32 (!%p1158_p7), 1, %s1039_s25  }
  0x26   : > { %s689_s13 = sshll.u32 (!%p1158_p7), %s1198_s12, 3 }
  0x27   : > { %308 = sbr.rel (%p1158_p7) target bundleno = 579 (0x243), region = 40  ;;  %s314_s20 = scalar_lea.vmem (!%p1158_p7), [#allocation2], %s689_s13 }
  0x29   : > { %s295_s22 = scalar_lea.hbm %s1322_s0, %s687_s18  ;;  %s311_s18 = scalar_lea.sflag (!%p1158_p7), [#allocation3], %s1198_s12 }
  0x2a   : > { %s297_s23 = sshll.u32 %s295_s22, 4  ;;  %s298_s23 = int_to_ptr.hbm [resolvable:$true] %s297_s23 }
  0x2b   : > { %740 = dma.hbm_to_vmem [thread:$0]  (!%p738_p10), %s298_s23, 128, %s300_s1, %s287_s3  }
  0x2c   : > { %1018 = dma.done.wait (%p1145_p3), %s311_s18, 128  }
  0x2d   : > { %1020 = vsyncadd (%p1145_p3), %s311_s18, 4294967168 }
  0x2e   : > { %1022 = dma.done.wait (%p63_p1), [#allocation6], 272  }
  0x2f   : > { %1024 = vsyncadd (%p63_p1), [#allocation6], 4294967024  ;;  %vm370_vm0 = vcmask 261120   ;;  %v367_v0 = vld [vmem:[%s314_s20] sm:$0xff]  ;;  %v1061_v2 = vmov 32.0   ;;  %v712_v15 = vld [vmem:[#allocation7] sm:$0xff] }
  0x30   : > { %v371_v1 = vsel %vm370_vm0, %v367_v0, 0.0  ;;  %815 = vrcp.f32 %v1061_v2  ;;  %v713_v14 = vld [vmem:[#allocation7 + $0x8] sm:$0xff]  ;;  %v812_v25 = vld [vmem:[#allocation5] ss:$0 sm:$0xff]  ;;  %s1220_s14 = sshll.u32 %s1198_s12, 2  ;;  %s1223_s16 = sshll.u32 %s1047_s27, 2 }
  0x31   : > { %372 = vadd.xlane.f32.xlu0 %v371_v1  ;;  %438 = vmatpush.bf16.msra.mxu0 %v713_v14  ;;  %v813_v28 = vld [vmem:[%s1306_s2] ss:$0 sm:$0xff]  ;;  %s481_s22 = scalar_lea.hbm %s1309_s5, %s1223_s16  ;;  %s351_s23 = scalar_lea.vmem [#allocation8], %s1220_s14  ;;  %vm447_vm5 = vcmask 257024  }
  0x32   : > { %v814_v32 = vld [vmem:[%s1308_s4] ss:$0 sm:$0xff]  ;;  %s483_s13 = sshll.u32 %s351_s23, 4  ;;  %s485_s18 = sshll.u32 %s481_s22, 4  ;;  %s484_s13 = int_to_ptr.vmem [resolvable:$true] %s483_s13  ;;  %s486_s18 = int_to_ptr.hbm [resolvable:$true] %s485_s18 }
  0x33   : > { %s1062_s20 = smov 96   ;;  %s460_s27 = scalar_lea.sflag [#allocation4], %s1198_s12 }
  0x34   : > { %s923_s1 = sshra.s32 %s486_s18, 4  ;;  %s929_s17 = scalar_lea.hbm %s1309_s5, 8  ;;  %s924_s1 = int_to_ptr.hbm [resolvable:$true] %s923_s1 }
  0x35   : > { %439 = vmatpush.bf16.msra.mxu0 %v712_v15  ;;  %s925_s3 = scalar_lea.hbm %s924_s1, 4  ;;  %p930_p11 = scmp.lt.s32.totalorder %s924_s1, %s1309_s5 }
  0x36   : > { %v816_v3 = vpop.eup %815  ;;  %p926_p1 = scmp.ne.s32.totalorder %s924_s1, %s925_s3  ;;  %p931_p12 = scmp.lt.s32.totalorder %s929_s17, %s925_s3 }
  0x37   : > { %v375_v4 = vmul.f32 32.0, %v816_v3  ;;  %vm379_vm1 = vweird.f32 %v816_v3 }
  0x38   : > { %p927_p3 = pnand %p926_p1, %p1178_p2  ;;  %p932_p13 = por %p931_p12, %p930_p11 }
  0x39   : > { %v376_v5 = vsub.f32 1.0, %v375_v4 }
  0x3a   : > { %p928_p7 = pneg %p927_p3 }
  0x3b   : > { %v377_v6 = vmul.f32 %v816_v3, %v376_v5 }
  0x3c   : > { %p933_p0 = pnand %p932_p13, %p928_p7 }
  0x3d   : > { %v378_v7 = vadd.f32 %v816_v3, %v377_v6 }
  0x3f   : > { %v380_v8 = vsel %vm379_vm1, %v816_v3, %v378_v7 }
  0xa4   : > { %v373_v9 = vpop.xlane.xlu0 %372 }
  0xa5   : > { %v381_v10 = vmul.f32 %v380_v8, %v373_v9 }
  0xa7   : > { %v382_v11 = vsub.f32 %v367_v0, %v381_v10 }
  0xa9   : > { %v383_v12 = vmul.f32 %v382_v11, %v382_v11 }
  0xab   : > { %v384_v13 = vsel %vm370_vm0, %v383_v12, 0.0 }
  0xac   : > { %385 = vadd.xlane.f32.xlu0 %v384_v13 }
 0x11f   : > { %v386_v16 = vpop.xlane.xlu0 %385 }
 0x120   : > { %v387_v17 = vmul.f32 %v386_v16, %v380_v8 }
 0x122   : > { %v388_v18 = vadd.f32 1e-05, %v387_v17 }
 0x124   : > { %817 = vrsqrt.f32 %v388_v18  ;;  %vm395_vm3 = vweird.f32 %v388_v18 }
 0x12a   : > { %v818_v19 = vpop.eup %817 }
 0x12b   : > { %v390_v20 = vmul.f32 %v818_v19, %v388_v18  ;;  %vm396_vm2 = vweird.f32 %v818_v19 }
 0x12c   : > { %vm397_vm4 = vmor %vm395_vm3, %vm396_vm2 }
 0x12d   : > { %v391_v21 = vmul.f32 %v818_v19, %v390_v20 }
 0x12f   : > { %v392_v22 = vmul.f32 0.5, %v391_v21 }
 0x131   : > { %v393_v23 = vsub.f32 1.5, %v392_v22 }
 0x133   : > { %v394_v24 = vmul.f32 %v818_v19, %v393_v23 }
 0x135   : > { %v398_v26 = vsel %vm397_vm4, %v818_v19, %v394_v24 }
 0x136   : > { %v399_v27 = vmul.f32 %v398_v26, %v382_v11 }
 0x138   : > { %v403_v29 = vmul.f32 %v812_v25, %v399_v27 }
 0x13a   : > { %v407_v30 = vadd.f32 %v813_v28, %v403_v29 }
 0x13c   : > { %v408_v31 = vpack.c.bf16 %v407_v30, %v407_v30 }
 0x13e   : > { %703 = vmatmul.msk.bf16.vlgmr.msra.gmra.mxu0 %vm370_vm0, %v408_v31 }
 0x1bb   : > { %v441_v33 = vpop.f32.mrf.mxu0 }
 0x1bc   : > { %v442_v34 = vadd.f32 %v814_v32, %v441_v33 }
 0x1be   : > { %v445_v35 = vmul.f32 0.35355338, %v442_v34  ;;  %v449_v36 = vpack.c.bf16 %v442_v34, %v442_v34 }
 0x1c0   : > { %v446_v37 = vpack.c.bf16 %v445_v35, %v445_v35  ;;  %451 = vrot.lane.b32.xlu1 %v449_v36, %s1062_s20 }
 0x1c2   : > { %448 = vst.msk [vmem:[%s351_s23] sm:$0xf] %vm447_vm5, %v446_v37 }
 0x1c3   : > { %v443_v38 = vpop.f32.mrf.mxu0 }
 0x1c4   : > { %936 = shalt.err (!%p933_p0)
}
 0x1c5   : > { %724 = dma.vmem_to_hbm [thread:$0]  (%p1178_p2), %s484_s13, 64, %s486_s18, %s460_s27  }
 0x1c6   : > { %s1063_s12 = smov 64   ;;  %s496_s8 = scalar_lea.hbm %s1310_s6, %s1223_s16 }
 0x1c7   : > { %s464_s9 = sand.u32 1, %s1135_s30   ;;  %s358_s1 = scalar_lea.vmem [#allocation9], %s1220_s14 }
 0x1c8   : > { %455 = vrot.lane.b32.xlu1 %v449_v36, %s1063_s12  ;;  %s498_s3 = sshll.u32 %s358_s1, 4  ;;  %s500_s17 = sshll.u32 %s496_s8, 4  ;;  %s499_s3 = int_to_ptr.vmem [resolvable:$true] %s498_s3  ;;  %s501_s17 = int_to_ptr.hbm [resolvable:$true] %s500_s17 }
 0x1c9   : > { %s511_s13 = scalar_lea.hbm %s1311_s7, %s1223_s16  ;;  %s1253_s18 = scalar_lea.sflag [#allocation10], %s464_s9 }
 0x1ca   : > { %s951_s27 = sshra.s32 %s501_s17, 4  ;;  %s957_s20 = scalar_lea.hbm %s1310_s6, 8  ;;  %s952_s27 = int_to_ptr.hbm [resolvable:$true] %s951_s27 }
 0x1cb   : > { %s953_s12 = scalar_lea.hbm %s952_s27, 4  ;;  %p958_p10 = scmp.lt.s32.totalorder %s952_s27, %s1310_s6 }
 0x1cc   : > { %p954_p4 = scmp.ne.s32.totalorder %s952_s27, %s953_s12  ;;  %p959_p1 = scmp.lt.s32.totalorder %s957_s20, %s953_s12 }
 0x1ce   : > { %p955_p6 = pnand %p954_p4, %p1178_p2  ;;  %p960_p3 = por %p959_p1, %p958_p10 }
 0x1d0   : > { %p956_p9 = pneg %p955_p6 }
 0x1d2   : > { %p961_p7 = pnand %p960_p3, %p956_p9 }
 0x232   : > { %v452_v39 = vpop.permute.xlu1 %451 }
 0x233   : > { %454 = vst.msk [vmem:[%s358_s1] sm:$0xf] %vm447_vm5, %v452_v39 }
 0x234   : > { %964 = shalt.err (!%p961_p7)
}
 0x235   : > { %725 = dma.vmem_to_hbm [thread:$0]  (%p1178_p2), %s499_s3, 64, %s501_s17, %s1253_s18  }
 0x236   : > { %s365_s16 = scalar_lea.vmem [#allocation11], %s1220_s14  ;;  %s515_s1 = sshll.u32 %s511_s13, 4  ;;  %s516_s1 = int_to_ptr.hbm [resolvable:$true] %s515_s1 }
 0x237   : > { %s513_s9 = sshll.u32 %s365_s16, 4  ;;  %s979_s0 = sshra.s32 %s516_s1, 4  ;;  %s514_s9 = int_to_ptr.vmem [resolvable:$true] %s513_s9  ;;  %s980_s0 = int_to_ptr.hbm [resolvable:$true] %s979_s0 }
 0x238   : > { %s981_s21 = scalar_lea.hbm %s980_s0, 4  ;;  %s985_s12 = scalar_lea.hbm %s1311_s7, 8 }
 0x239   : > { %p982_p11 = scmp.ne.s32.totalorder %s980_s0, %s981_s21  ;;  %p986_p0 = scmp.lt.s32.totalorder %s980_s0, %s1311_s7 }
 0x23a   : > { %v456_v40 = vpop.permute.xlu1 %455  ;;  %p987_p4 = scmp.lt.s32.totalorder %s985_s12, %s981_s21 }
 0x23b   : > { %458 = vst.msk [vmem:[%s365_s16] sm:$0xf] %vm447_vm5, %v456_v40  ;;  %p983_p12 = pnand %p982_p11, %p1178_p2 }
 0x23c   : > { %p988_p6 = por %p987_p4, %p986_p0 }
 0x23d   : > { %p984_p13 = pneg %p983_p12 }
 0x23f   : > { %p989_p9 = pnand %p988_p6, %p984_p13 }
 0x241   : > { %992 = shalt.err (!%p989_p9)
}
 0x242   : > { %726 = dma.vmem_to_hbm [thread:$0]  (%p1178_p2), %s514_s9, 64, %s516_s1, %s1253_s18  }
 0x243 PF: > { %s527_s17 = sand.u32 1, %s1035_s24   ;;  %p742_p10 = pnand %p685_p8, %p1150_p5 }
 0x244   : > { %s528_s13 = scalar_lea.sflag [#allocation4], %s527_s17 }
 0x245   : > { %p743_p1 = pneg %p742_p10 }
 0x247   : > { %1026 = dma.done.wait (%p743_p1), %s528_s13, 64  }
 0x248   : > { %1028 = vsyncadd (%p743_p1), %s528_s13, 4294967232  ;;  %s1323_s30 = sadd.s32 4294967294, %s1055_s29  }
 0x249   : > { %s537_s23 = sand.u32 1, %s1323_s30  }
 0x24a   : > { %s538_s20 = scalar_lea.sflag [#allocation10], %s537_s23 }
 0x24b   : > { %1030 = dma.done.wait (%p743_p1), %s538_s20, 128  }
 0x24c   : > { %1032 = vsyncadd (%p743_p1), %s538_s20, 4294967168  ;;  %s28_s29 = sadd.s32 1, %s1055_s29   ;;  %s1324_s24 = smov %s1039_s25 }
 0x24d   : > { %p25_p2 = scmp.ge.s32.totalorder %s28_s29, 4   ;;  %s1325_s25 = smov %s1043_s26 }
 0x24e   : > { %s1326_s26 = smov %s1188_s19  ;;  %s1327_s27 = smov %s1051_s28 }
 0x24f   : > { %s1328_s28 = smov %s1330_s11  ;;  %27 = sbr.rel (!%p25_p2) target bundleno = 13 (0xd), region = 125 }
 0x254   :  { %554 = vsyncpa [#allocation3], 1 }
 0x255   :  { %556 = vsyncpa [#allocation3 + $0x1], 1 }
 0x256   :  { %557 = vsyncpa [#allocation6], 1 }
 0x257   :  { %558 = vsyncpa [#allocation4], 1 }
 0x258   :  { %560 = vsyncpa [#allocation4 + $0x1], 1 }
 0x259   :  { %561 = vsyncpa [#allocation10], 1 }
 0x25a   :  { %563 = vsyncpa [#allocation10 + $0x1], 1 }

</bundles_post_ra>
